<compile_context>
chip_gen: v7x
topology: tpu7x:2x2x1
jax: 0.10.0
libtpu: 0.0.40
codegen_flags: <defaults>
</compile_context>

<pallas_src>
import functools

import jax
import jax.numpy as jnp
import numpy as np
from jax.experimental import pallas as pl
from jax.experimental.pallas import tpu as pltpu


def _partial_sums_kernel(preds_ref, target_ref, out_ref, *, quantiles, low_penalty):
    """One B-tile: per-lane partial sums for each quantile + the trend term.

    preds_ref:  (Q, TB, T)  native dtype
    target_ref: (TB, T)     native dtype
    out_ref:    (Q+1, T)    f32   (leading grid dim squeezed via block_shape None)
    """
    q_n = len(quantiles)
    t = target_ref.shape[1]
    target = target_ref[...].astype(jnp.float32)

    for qi, q in enumerate(quantiles):
        pred = preds_ref[qi].astype(jnp.float32)              # (TB, T)
        err = target - pred
        # Pinball with asymmetric low_penalty rewritten as a single maximum:
        #   where(err > 0, err*q*lp, |err|*(1-q)) == max(err*(q*lp), err*(q-1))
        # for 0 <= q <= 1 and lp >= 0.  (2 muls + 1 max instead of 5 VALU ops.)
        w = jnp.maximum(err * (q * low_penalty), err * (q - 1.0))
        # Sublane-only reduce; the cheap cross-lane reduce of the tiny
        # (NB, Q+1, T) partials happens in the wrapper.
        out_ref[qi:qi + 1, :] = jnp.sum(w, axis=0, keepdims=True)

    # Trend term on the p50 channel (index 1, matching the PyTorch module):
    #   |diff(p50, time) - diff(target, time)| == |diff(p50 - target, time)|
    # p50 is re-read here (not carried through the quantile loop) so a full
    # (TB, T) f32 tile is not held live across the loop.
    d = preds_ref[1].astype(jnp.float32) - target               # (TB, T)
    tr = jnp.abs(d[:, 1:] - d[:, :-1])                          # (TB, T-1)
    out_ref[q_n:q_n + 1, t - 1:t] = jnp.zeros((1, 1), jnp.float32)
    out_ref[q_n:q_n + 1, 0:t - 1] = jnp.sum(tr, axis=0, keepdims=True)


def _vmem_limit_bytes():
    """Generation-aware VMEM limit: ~3/4 of physical VMEM, capped at 64 MiB.

    v5e/v6e have 128 MiB physical (-> 64 MiB limit); v7x has 64 MiB per core
    (-> 48 MiB limit).  Falls back conservatively if the query is unavailable.
    """
    phys = 64 * 1024 * 1024
    try:
        info = pltpu.get_tpu_info()
        for attr in ("vmem_capacity_bytes", "vmem_size_bytes", "vmem_bytes"):
            v = getattr(info, attr, None)
            if isinstance(v, (int, np.integer)) and int(v) > 0:
                phys = int(v)
                break
    except Exception:
        pass
    return int(min(64 * 1024 * 1024, (phys * 3) // 4))


def _pick_block_b(b, t, q_n, preds_itemsize, target_itemsize, budget_bytes):
    """Largest B-tile whose double-buffered input blocks plus in-kernel f32
    temporaries fit the budget, while keeping >= ~4 grid steps when B allows
    (so the DMA pipeline has depth and the 'parallel' axis shards on v7x)."""
    t_pad = ((t + 127) // 128) * 128
    in_bytes = q_n * t_pad * preds_itemsize + t_pad * target_itemsize
    f32_temps = 3 * t_pad * 4                   # target + pred + err/w tiles
    per_row = 2 * in_bytes + f32_temps          # x2: double-buffered inputs
    tb = budget_bytes // max(per_row, 1)
    tb = min(tb, max(8, pl.cdiv(b, 4)))         # enforce minimum grid depth
    tb = max(8, (tb // 8) * 8)                  # sublane-aligned
    return int(tb)


@functools.partial(jax.jit, static_argnames=("quantiles", "low_penalty", "block_b"))
def scale_aware_quantile_loss_qmajor(preds_qbt, target,
                                     quantiles=(0.1, 0.5, 0.9),
                                     low_penalty=20.0,
                                     block_b=None):
    """preds_qbt: (Q, B, T), target: (B, T). Returns (total_loss, per-quantile losses)."""
    q_n, b, t = preds_qbt.shape
    assert target.shape == (b, t)
    assert q_n == len(quantiles)
    # Primary PyTorch branch (trend loss on quantile index 1) requires Q >= 2, T > 1.
    assert q_n >= 2 and t > 1
    # NOTE: like the PyTorch module, the trend term hardcodes quantile index 1
    # as the p50 channel; quantiles should be ordered with the median second.

    p_isz = jnp.dtype(preds_qbt.dtype).itemsize
    t_isz = jnp.dtype(target.dtype).itemsize
    vmem_limit = _vmem_limit_bytes()
    budget = (vmem_limit * 3) // 5              # <=60% of the scoped limit

    if block_b is not None:
        tb = int(block_b)
    else:
        tb = _pick_block_b(b, t, q_n, p_isz, t_isz, budget)
    tb = max(8, (tb // 8) * 8)
    tb = min(tb, ((b + 7) // 8) * 8)            # never exceed padded B
    nb = pl.cdiv(b, tb)
    b_pad = nb * tb

    if b_pad != b:
        # Zero rows contribute exactly 0 to both the pinball and trend sums
        # (err == 0, diff == 0), so no in-kernel masking is needed.
        # Denominators below keep using the TRUE b.
        preds_qbt = jnp.pad(preds_qbt, ((0, 0), (0, b_pad - b), (0, 0)))
        target = jnp.pad(target, ((0, b_pad - b), (0, 0)))

    kernel = functools.partial(
        _partial_sums_kernel,
        quantiles=tuple(float(x) for x in quantiles),
        low_penalty=float(low_penalty))

    cost = pl.CostEstimate(
        flops=6 * (q_n + 1) * b_pad * t,
        transcendentals=0,
        bytes_accessed=(q_n * b_pad * t * p_isz + b_pad * t * t_isz
                        + nb * (q_n + 1) * t * 4))

    partials = pl.pallas_call(
        kernel,
        out_shape=jax.ShapeDtypeStruct((nb, q_n + 1, t), jnp.float32),
        grid=(nb,),
        in_specs=[
            pl.BlockSpec((q_n, tb, t), lambda i: (0, i, 0)),
            pl.BlockSpec((tb, t), lambda i: (i, 0)),
        ],
        out_specs=pl.BlockSpec((None, q_n + 1, t), lambda i: (i, 0, 0)),
        compiler_params=pltpu.CompilerParams(
            dimension_semantics=("parallel",),
            vmem_limit_bytes=vmem_limit),
        cost_estimate=cost,
    )(preds_qbt, target)

    sums = jnp.sum(partials, axis=(0, 2))                   # (Q+1,)
    losses = sums[:q_n] / float(b * t)                      # true (unpadded) B
    base_loss = jnp.mean(losses)
    trend_loss = sums[q_n] * (0.5 / float(b * (t - 1)))
    return base_loss + trend_loss, losses


@functools.partial(jax.jit, static_argnames=("quantiles", "low_penalty", "block_b"))
def scale_aware_quantile_loss(preds, target,
                              quantiles=(0.1, 0.5, 0.9),
                              low_penalty=20.0,
                              block_b=None):
    """preds: (B, T, Q) (PyTorch layout), target: (B, T)."""
    assert preds.ndim == 3 and target.ndim == 2
    assert preds.shape[-1] == len(quantiles)
    # TODO(synk): the PyTorch fallback branches (preds.dim()==target.dim(),
    # Q==1 squeeze path, T==1 no-trend path) and numpy_normalised_quantile_loss
    # are not kernelized; only the primary forward branch is implemented.
    preds_qbt = jnp.transpose(preds, (2, 0, 1))  # fuses with producer / pad under jit
    return scale_aware_quantile_loss_qmajor(
        preds_qbt, target, quantiles=quantiles, low_penalty=low_penalty,
        block_b=block_b)


def _reference_loss(preds, target, quantiles, low_penalty):
    losses = []
    for i, q in enumerate(quantiles):
        errors = target - preds[..., i]
        weighted = jnp.where(errors > 0, errors * q * low_penalty,
                             jnp.abs(errors) * (1.0 - q))
        losses.append(weighted.mean())
    p50 = preds[..., 1]
    pred_diff = p50[:, 1:] - p50[:, :-1]
    target_diff = target[:, 1:] - target[:, :-1]
    trend = jnp.mean(jnp.abs(pred_diff - target_diff)) * 0.5
    base = jnp.stack(losses).mean()
    return base + trend, jnp.stack(losses)


def _check(preds, target, quantiles, low_penalty, block_b=None):
    total, losses = scale_aware_quantile_loss(
        preds, target, quantiles=quantiles, low_penalty=low_penalty,
        block_b=block_b)
    total, losses = jax.block_until_ready((total, losses))
    ref_total, ref_losses = _reference_loss(preds, target, quantiles, low_penalty)
    np.testing.assert_allclose(np.asarray(total), np.asarray(ref_total),
                               rtol=1e-5, atol=1e-5)
    np.testing.assert_allclose(np.asarray(losses), np.asarray(ref_losses),
                               rtol=1e-5, atol=1e-5)


if __name__ == "__main__":
    quantiles = (0.1, 0.5, 0.9)
    low_penalty = 20.0

    key = jax.random.PRNGKey(0)
    k1, k2, k3, k4, k5, k6 = jax.random.split(key, 6)

    # Case 1: tiny batch, single (zero-padded) block, auto block size.
    B, T, Q = 2, 8, len(quantiles)
    preds = jax.random.normal(k1, (B, T, Q), dtype=jnp.float32)
    target = jax.random.normal(k2, (B, T), dtype=jnp.float32)
    _check(preds, target, quantiles, low_penalty)

    # Case 2: multi-block grid with a partial last tile (exercises B padding).
    B2, T2 = 20, 16
    preds2 = jax.random.normal(k3, (B2, T2, Q), dtype=jnp.float32)
    target2 = jax.random.normal(k4, (B2, T2), dtype=jnp.float32)
    _check(preds2, target2, quantiles, low_penalty, block_b=8)

    # Case 3: lane-dense T, evenly divisible B, auto block size (no padding path).
    B3, T3 = 32, 128
    preds3 = jax.random.normal(k5, (B3, T3, Q), dtype=jnp.float32)
    target3 = jax.random.normal(k6, (B3, T3), dtype=jnp.float32)
    _check(preds3, target3, quantiles, low_penalty)

    print("KERNEL_OK")
</pallas_src>

<mosaic_0001>
module attributes {stable_mosaic.version = 11 : i64} {
  func.func @_partial_sums_kernel(%arg0: i32, %arg1: memref<3x8x8xf32, #tpu.memory_space<vmem>>, %arg2: memref<8x8xf32, #tpu.memory_space<vmem>>, %arg3: memref<1x4x8xf32, #tpu.memory_space<vmem>>) attributes {dimension_semantics = [#tpu.dimension_semantics<parallel>], iteration_bounds = array<i64: 1>, scalar_prefetch = 0 : i64, scratch_operands = 0 : i64, tpu.core_type = #tpu.core_type<tc>, window_params = [{transform_indices = @transform_0, window_bounds = array<i64: 3, 8, 8>}, {transform_indices = @transform_1, window_bounds = array<i64: 8, 8>}, {transform_indices = @transform_2, window_bounds = array<i64: 1, 4, 8>}]} {
    %c0 = arith.constant 0 : index
    %c0_0 = arith.constant 0 : index
    %0 = vector.load %arg2[%c0, %c0_0] : memref<8x8xf32, #tpu.memory_space<vmem>>, vector<8x8xf32>
    %c0_1 = arith.constant 0 : index
    %c0_2 = arith.constant 0 : index
    %c0_3 = arith.constant 0 : index
    %1 = vector.load %arg1[%c0_1, %c0_2, %c0_3] : memref<3x8x8xf32, #tpu.memory_space<vmem>>, vector<1x8x8xf32>
    %2 = vector.shape_cast %1 : vector<1x8x8xf32> to vector<8x8xf32>
    %3 = arith.subf %0, %2 : vector<8x8xf32>
    %cst = arith.constant 2.000000e+00 : f32
    %4 = vector.broadcast %cst : f32 to vector<8x8xf32>
    %5 = arith.mulf %3, %4 : vector<8x8xf32>
    %cst_4 = arith.constant -0.899999976 : f32
    %6 = vector.broadcast %cst_4 : f32 to vector<8x8xf32>
    %7 = arith.mulf %3, %6 : vector<8x8xf32>
    %8 = arith.maximumf %5, %7 : vector<8x8xf32>
    %cst_5 = arith.constant dense<0.000000e+00> : vector<8xf32>
    %9 = vector.multi_reduction <add>, %8, %cst_5 [0] : vector<8x8xf32> to vector<8xf32>
    %10 = vector.shape_cast %9 : vector<8xf32> to vector<1x8xf32>
    %c0_6 = arith.constant 0 : index
    %c0_7 = arith.constant 0 : index
    %c0_8 = arith.constant 0 : index
    %11 = vector.load %arg3[%c0_6, %c0_7, %c0_8] : memref<1x4x8xf32, #tpu.memory_space<vmem>>, vector<1x1x8xf32>
    %12 = vector.shape_cast %11 : vector<1x1x8xf32> to vector<1x8xf32>
    %13 = vector.shape_cast %10 : vector<1x8xf32> to vector<1x1x8xf32>
    tpu.vector_store %arg3[%c0_6, %c0_7, %c0_8], %13 {strides = array<i32>} : memref<1x4x8xf32, #tpu.memory_space<vmem>>, vector<1x1x8xf32>,
    %c1 = arith.constant 1 : index
    %c0_9 = arith.constant 0 : index
    %c0_10 = arith.constant 0 : index
    %14 = vector.load %arg1[%c1, %c0_9, %c0_10] : memref<3x8x8xf32, #tpu.memory_space<vmem>>, vector<1x8x8xf32>
    %15 = vector.shape_cast %14 : vector<1x8x8xf32> to vector<8x8xf32>
    %16 = arith.subf %0, %15 : vector<8x8xf32>
    %cst_11 = arith.constant 1.000000e+01 : f32
    %17 = vector.broadcast %cst_11 : f32 to vector<8x8xf32>
    %18 = arith.mulf %16, %17 : vector<8x8xf32>
    %cst_12 = arith.constant -5.000000e-01 : f32
    %19 = vector.broadcast %cst_12 : f32 to vector<8x8xf32>
    %20 = arith.mulf %16, %19 : vector<8x8xf32>
    %21 = arith.maximumf %18, %20 : vector<8x8xf32>
    %cst_13 = arith.constant dense<0.000000e+00> : vector<8xf32>
    %22 = vector.multi_reduction <add>, %21, %cst_13 [0] : vector<8x8xf32> to vector<8xf32>
    %23 = vector.shape_cast %22 : vector<8xf32> to vector<1x8xf32>
    %c0_14 = arith.constant 0 : index
    %c1_15 = arith.constant 1 : index
    %c0_16 = arith.constant 0 : index
    %24 = vector.load %arg3[%c0_14, %c1_15, %c0_16] : memref<1x4x8xf32, #tpu.memory_space<vmem>>, vector<1x1x8xf32>
    %25 = vector.shape_cast %24 : vector<1x1x8xf32> to vector<1x8xf32>
    %26 = vector.shape_cast %23 : vector<1x8xf32> to vector<1x1x8xf32>
    tpu.vector_store %arg3[%c0_14, %c1_15, %c0_16], %26 {strides = array<i32>} : memref<1x4x8xf32, #tpu.memory_space<vmem>>, vector<1x1x8xf32>,
    %c2 = arith.constant 2 : index
    %c0_17 = arith.constant 0 : index
    %c0_18 = arith.constant 0 : index
    %27 = vector.load %arg1[%c2, %c0_17, %c0_18] : memref<3x8x8xf32, #tpu.memory_space<vmem>>, vector<1x8x8xf32>
    %28 = vector.shape_cast %27 : vector<1x8x8xf32> to vector<8x8xf32>
    %29 = arith.subf %0, %28 : vector<8x8xf32>
    %cst_19 = arith.constant 1.800000e+01 : f32
    %30 = vector.broadcast %cst_19 : f32 to vector<8x8xf32>
    %31 = arith.mulf %29, %30 : vector<8x8xf32>
    %cst_20 = arith.constant -1.000000e-01 : f32
    %32 = vector.broadcast %cst_20 : f32 to vector<8x8xf32>
    %33 = arith.mulf %29, %32 : vector<8x8xf32>
    %34 = arith.maximumf %31, %33 : vector<8x8xf32>
    %cst_21 = arith.constant dense<0.000000e+00> : vector<8xf32>
    %35 = vector.multi_reduction <add>, %34, %cst_21 [0] : vector<8x8xf32> to vector<8xf32>
    %36 = vector.shape_cast %35 : vector<8xf32> to vector<1x8xf32>
    %c0_22 = arith.constant 0 : index
    %c2_23 = arith.constant 2 : index
    %c0_24 = arith.constant 0 : index
    %37 = vector.load %arg3[%c0_22, %c2_23, %c0_24] : memref<1x4x8xf32, #tpu.memory_space<vmem>>, vector<1x1x8xf32>
    %38 = vector.shape_cast %37 : vector<1x1x8xf32> to vector<1x8xf32>
    %39 = vector.shape_cast %36 : vector<1x8xf32> to vector<1x1x8xf32>
    tpu.vector_store %arg3[%c0_22, %c2_23, %c0_24], %39 {strides = array<i32>} : memref<1x4x8xf32, #tpu.memory_space<vmem>>, vector<1x1x8xf32>,
    %c1_25 = arith.constant 1 : index
    %c0_26 = arith.constant 0 : index
    %c0_27 = arith.constant 0 : index
    %40 = vector.load %arg1[%c1_25, %c0_26, %c0_27] : memref<3x8x8xf32, #tpu.memory_space<vmem>>, vector<1x8x8xf32>
    %41 = vector.shape_cast %40 : vector<1x8x8xf32> to vector<8x8xf32>
    %42 = arith.subf %41, %0 : vector<8x8xf32>
    %43 = vector.extract_strided_slice %42 {offsets = [0, 1], sizes = [8, 7], strides = [1, 1]} : vector<8x8xf32> to vector<8x7xf32>
    %44 = vector.extract_strided_slice %42 {offsets = [0, 0], sizes = [8, 7], strides = [1, 1]} : vector<8x8xf32> to vector<8x7xf32>
    %45 = arith.subf %43, %44 : vector<8x7xf32>
    %46 = math.absf %45 : vector<8x7xf32>
    %cst_28 = arith.constant 0.000000e+00 : f32
    %47 = vector.broadcast %cst_28 : f32 to vector<1x1xf32>
    %c0_29 = arith.constant 0 : index
    %c3 = arith.constant 3 : index
    %c7 = arith.constant 7 : index
    %48 = vector.load %arg3[%c0_29, %c3, %c7] : memref<1x4x8xf32, #tpu.memory_space<vmem>>, vector<1x1x1xf32>
    %49 = vector.shape_cast %48 : vector<1x1x1xf32> to vector<1x1xf32>
    %50 = vector.shape_cast %47 : vector<1x1xf32> to vector<1x1x1xf32>
    tpu.vector_store %arg3[%c0_29, %c3, %c7], %50 {strides = array<i32>} : memref<1x4x8xf32, #tpu.memory_space<vmem>>, vector<1x1x1xf32>,
    %cst_30 = arith.constant dense<0.000000e+00> : vector<7xf32>
    %51 = vector.multi_reduction <add>, %46, %cst_30 [0] : vector<8x7xf32> to vector<7xf32>
    %52 = vector.shape_cast %51 : vector<7xf32> to vector<1x7xf32>
    %c0_31 = arith.constant 0 : index
    %c3_32 = arith.constant 3 : index
    %c0_33 = arith.constant 0 : index
    %53 = vector.load %arg3[%c0_31, %c3_32, %c0_33] : memref<1x4x8xf32, #tpu.memory_space<vmem>>, vector<1x1x7xf32>
    %54 = vector.shape_cast %53 : vector<1x1x7xf32> to vector<1x7xf32>
    %55 = vector.shape_cast %52 : vector<1x7xf32> to vector<1x1x7xf32>
    tpu.vector_store %arg3[%c0_31, %c3_32, %c0_33], %55 {strides = array<i32>} : memref<1x4x8xf32, #tpu.memory_space<vmem>>, vector<1x1x7xf32>,
    return
  }
  func.func @transform_0(%arg0: i32) -> (i32, i32, i32) {
    %c0_i32 = arith.constant 0 : i32
    %c0_i32_0 = arith.constant 0 : i32
    %c0_i32_1 = arith.constant 0 : i32
    return %c0_i32, %arg0, %c0_i32_0 : i32, i32, i32
  }
  func.func @transform_1(%arg0: i32) -> (i32, i32) {
    %c0_i32 = arith.constant 0 : i32
    %c0_i32_0 = arith.constant 0 : i32
    return %arg0, %c0_i32 : i32, i32
  }
  func.func @transform_2(%arg0: i32) -> (i32, i32, i32) {
    %c0_i32 = arith.constant 0 : i32
    %c0_i32_0 = arith.constant 0 : i32
    %c0_i32_1 = arith.constant 0 : i32
    return %arg0, %c0_i32, %c0_i32_0 : i32, i32, i32
  }
}

</mosaic_0001>

<bundles_post_ra>
// kernel: scale_aware_quantile_loss_qmajor.1
= control target key start
LH: loop header
LB: loop body
LE: loop exit
PB: predicated region body
PF: predicated region fallthrough
CT: control target
= control target key end

     0   :  { %s89_s17 = smov 1   ;;  %vm63_vm0 = vcmask 57400   ;;  %v90_v8 = vmov 0.0   ;;  %vm17_vm1 = vcmask 64512   ;;  %vm65_vm2 = vcmask 64520   ;;  %s91_s24 = smov 127   ;;  %s134_s0 = inlined_call_operand.vmem [shape: f32[3,8,8], index: 0, kind: input, shape index: {}]   ;;  %s135_s1 = inlined_call_operand.vmem [shape: f32[8,8], index: 1, kind: input, shape index: {}]   ;;  %s136_s2 = inlined_call_operand.vmem [shape: f32[1,4,8], index: 2, kind: output, shape index: {}]  }
   0x1   :  { %v11_v0 = vld [vmem:[%s135_s1] sm:$0xff]  ;;  %v85_v1 = vld [vmem:[%s134_s0 + $0x8] sm:$0xff]  ;;  %v84_v6 = vld [vmem:[%s134_s0 + $0x10] sm:$0xff]  ;;  %64 = vst.msk [vmem:[%s136_s2 + $0x3] sm:$0x1] %vm63_vm0, %v90_v8  ;;  %vm25_vm3 = vcmask 57344  }
   0x2   :  { %v12_v2 = vld [vmem:[%s134_s0] sm:$0xff]  ;;  %v56_v3 = vsub.f32 %v85_v1, %v11_v0  ;;  %v29_v5 = vsub.f32 %v11_v0, %v85_v1  ;;  %v43_v7 = vsub.f32 %v11_v0, %v84_v6  ;;  %vm77_vm4 = vcmask 49152  }
   0x3   :  { %v13_v4 = vsub.f32 %v11_v0, %v12_v2 }
   0x4   :  { %58 = vrot.lane.b32.xlu0 %v56_v3, %s89_s17  ;;  %v30_v11 = vmul.f32 10.0, %v29_v5  ;;  %v31_v12 = vmul.f32 -0.5, %v29_v5  ;;  %v44_v13 = vmul.f32 18.0, %v43_v7  ;;  %v45_v14 = vmul.f32 -0.1, %v43_v7 }
   0x5   :  { %v14_v9 = vmul.f32 2.0, %v13_v4  ;;  %v15_v10 = vmul.f32 -0.9, %v13_v4 }
   0x6   :  { %v32_v16 = vmax.f32 %v30_v11, %v31_v12  ;;  %v46_v17 = vmax.f32 %v44_v13, %v45_v14 }
   0x7   :  { %v16_v15 = vmax.f32 %v14_v9, %v15_v10 }
   0x8   :  { %v33_v19 = vsel %vm17_vm1, %v32_v16, 0.0  ;;  %v47_v20 = vsel %vm17_vm1, %v46_v17, 0.0 }
   0x9   :  { %v18_v18 = vsel %vm17_vm1, %v16_v15, 0.0  ;;  %v34_v22 = vrot.slane %v33_v19, 4  ;;  %v48_v23 = vrot.slane %v47_v20, 4 }
   0xa   :  { %v19_v21 = vrot.slane %v18_v18, 4 }
   0xb   :  { %v35_v25 = vadd.f32 %v34_v22, %v33_v19  ;;  %v49_v26 = vadd.f32 %v48_v23, %v47_v20 }
   0xc   :  { %v20_v24 = vadd.f32 %v19_v21, %v18_v18 }
   0xd   :  { %v36_v28 = vrot.slane %v35_v25, 2  ;;  %v50_v29 = vrot.slane %v49_v26, 2 }
   0xe   :  { %v21_v27 = vrot.slane %v20_v24, 2 }
   0xf   :  { %v37_v31 = vadd.f32 %v36_v28, %v35_v25  ;;  %v51_v32 = vadd.f32 %v50_v29, %v49_v26 }
  0x10   :  { %v22_v30 = vadd.f32 %v21_v27, %v20_v24 }
  0x11   :  { %v38_v34 = vrot.slane %v37_v31, 1  ;;  %v52_v35 = vrot.slane %v51_v32, 1 }
  0x12   :  { %v23_v33 = vrot.slane %v22_v30, 1 }
  0x13   :  { %v39_v40 = vadd.f32 %v38_v34, %v37_v31  ;;  %v53_v41 = vadd.f32 %v52_v35, %v51_v32 }
  0x14   :  { %v24_v39 = vadd.f32 %v23_v33, %v22_v30 }
  0x15   :  { %40 = vst.msk [vmem:[%s136_s2 + $0x1] sm:$0x1] %vm25_vm3, %v39_v40  ;;  %54 = vst.msk [vmem:[%s136_s2 + $0x2] sm:$0x1] %vm25_vm3, %v53_v41 }
  0x16   :  { %26 = vst.msk [vmem:[%s136_s2] sm:$0x1] %vm25_vm3, %v24_v39 }
  0x76   :  { %v59_v36 = vpop.permute.xlu0 %58 }
  0x77   :  { %v61_v37 = vsub.f32 %v56_v3, %v59_v36 }
  0x79   :  { %v62_v38 = vand.u32 2147483647, %v61_v37 }
  0x7b   :  { %v66_v42 = vsel %vm65_vm2, %v62_v38, 0.0 }
  0x7c   :  { %v67_v43 = vrot.slane %v66_v42, 4 }
  0x7e   :  { %v68_v44 = vadd.f32 %v67_v43, %v66_v42 }
  0x80   :  { %v69_v45 = vrot.slane %v68_v44, 2 }
  0x82   :  { %v70_v46 = vadd.f32 %v69_v45, %v68_v44 }
  0x84   :  { %v71_v47 = vrot.slane %v70_v46, 1 }
  0x86   :  { %v72_v48 = vadd.f32 %v71_v47, %v70_v46 }
  0x88   :  { %74 = vrot.lane.b32.xlu0 %v72_v48, %s91_s24 }
  0xfa   :  { %v75_v49 = vpop.permute.xlu0 %74 }
  0xfb   :  { %78 = vst.msk [vmem:[%s136_s2 + $0x3] sm:$0x1] %vm77_vm4, %v75_v49 }

</bundles_post_ra>
